<compile_context>
chip_gen: v7x
topology: tpu7x:2x2x1
jax: 0.10.0
libtpu: 0.0.40
codegen_flags: <defaults>
</compile_context>

<pallas_src>
import jax
import jax.numpy as jnp
from jax.experimental import pallas as pl
from jax.experimental.pallas import tpu as pltpu

# ---------------- problem sizes (small, consistent with an RCNN image input) --
N, C_IN, H, W = 2, 4, 16, 16       # input image batch, NCHW
C_OUT = 8                          # output channels of the conv stage
K = 3                              # 3x3 "same" convolution
HW = H * W                         # 256  -> lane-dense (2 x 128 lanes)
NHW = N * HW                       # 512  -> batch folded along lanes
KKC = K * K * C_IN                 # 36   -> contraction dim of the fused dot
KKC_PAD = 40                       # contraction dim padded to a multiple of 8
LPAD = 128                         # lane-aligned zero pad inside the scratch
HW_SCR = LPAD + HW + LPAD          # 512  -> padded flat image in VMEM scratch


# ----------------------------- Pallas kernel ---------------------------------
def _conv3x3_relu_kernel(x_ref, w_ref, b_ref, o_ref, xpad_ref, taps_ref):
    """Fused 3x3 "same" conv + bias + ReLU for the whole (N=2) batch.

    x_ref:    (N, C_IN, HW)     f32  -- row-major flattened images
    w_ref:    (C_OUT, KKC_PAD)  f32  -- columns ordered (dy, dx, ci); last
                                        KKC_PAD-KKC columns are zero
    b_ref:    (C_OUT, 1)        f32
    o_ref:    (N, C_OUT, HW)    f32  -- lane-dense output per image
    xpad_ref: (N, C_IN, HW_SCR) f32  -- VMEM scratch: zero-padded image copies
    taps_ref: (KKC_PAD, NHW)    f32  -- VMEM scratch: fused im2col matrix
    """
    # In-kernel "SAME" padding (replaces the old wrapper-side jnp.pad / extra
    # HBM round-trip): zero the scratch, drop each image at a 128-lane-aligned
    # offset so the copy is a full-lane unmasked store.
    xpad_ref[...] = jnp.zeros_like(xpad_ref)
    for n in range(N):
        xpad_ref[n, :, pl.ds(LPAD, HW)] = x_ref[n]

    # Horizontal row-wrap masks (vertical out-of-bounds is covered by the
    # zero-pad regions of the scratch).  Hard-wired to K == 3.
    col = jax.lax.broadcasted_iota(jnp.int32, (C_IN, HW), 1) % W
    left_edge = col == 0            # bad for dx == 0 taps
    right_edge = col == (W - 1)     # bad for dx == K-1 taps

    # Zero the contraction-pad rows (KKC..KKC_PAD); data rows are overwritten.
    taps_ref[pl.ds(KKC, KKC_PAD - KKC), :] = jnp.zeros(
        (KKC_PAD - KKC, NHW), dtype=jnp.float32)

    # Build the im2col matrix ONCE: each of the 9 taps is a single contiguous
    # shifted read from the padded scratch plus a cheap edge mask; image n
    # occupies lanes [n*HW, (n+1)*HW).
    for dy in range(K):
        for dx in range(K):
            t = dy * K + dx
            off = LPAD + (dy - 1) * W + (dx - 1)
            for n in range(N):
                tap = xpad_ref[n, :, pl.ds(off, HW)]          # (C_IN, HW)
                if dx == 0:
                    tap = jnp.where(left_edge, 0.0, tap)
                elif dx == K - 1:
                    tap = jnp.where(right_edge, 0.0, tap)
                taps_ref[pl.ds(t * C_IN, C_IN), pl.ds(n * HW, HW)] = tap

    # One fused MXU matmul (8,40)x(40,512) instead of nine (8,4)x(4,256) dots.
    acc = jnp.dot(w_ref[...], taps_ref[...],
                  preferred_element_type=jnp.float32)          # (C_OUT, NHW)
    acc = jnp.maximum(acc + b_ref[...], 0.0)                   # bias + ReLU

    # Lane-dense (C_OUT, HW) = (8, 256) stores, one per image.
    for n in range(N):
        o_ref[n] = acc[:, n * HW:(n + 1) * HW]


def conv3x3_relu_pallas(x_nchw, w_mat, b_mat):
    """3x3 same conv + bias + ReLU.  x_nchw: [N, C_IN, H, W] -> [N, C_OUT, H, W]."""
    n, c, h, w = x_nchw.shape
    assert (n, c, h, w) == (N, C_IN, H, W)

    # Metadata-only reshape.  No pad / im2col / transpose in the wrapper.
    x_flat = x_nchw.reshape(n, c, h * w).astype(jnp.float32)

    out = pl.pallas_call(
        _conv3x3_relu_kernel,
        out_shape=jax.ShapeDtypeStruct((n, C_OUT, h * w), jnp.float32),
        grid=(1,),                                            # single step
        in_specs=[
            pl.BlockSpec((n, c, h * w), lambda i: (0, 0, 0)),        # images
            pl.BlockSpec((C_OUT, KKC_PAD), lambda i: (0, 0)),        # weight
            pl.BlockSpec((C_OUT, 1), lambda i: (0, 0)),              # bias
        ],
        out_specs=pl.BlockSpec((n, C_OUT, h * w), lambda i: (0, 0, 0)),
        scratch_shapes=[
            pltpu.VMEM((n, c, HW_SCR), jnp.float32),          # padded images
            pltpu.VMEM((KKC_PAD, n * h * w), jnp.float32),    # im2col taps
        ],
        compiler_params=pltpu.CompilerParams(
            dimension_semantics=("arbitrary",)),
    )(x_flat, w_mat, b_mat)

    return out.reshape(n, C_OUT, h, w)                        # metadata -> NCHW


# ----------------------------- WrappedModel ----------------------------------
class WrappedModelJAX:
    """Mirrors `forward(x): return self.model([x])[0]`."""

    def __init__(self, model_fn):
        self.model_fn = model_fn

    def __call__(self, x):
        outs = self.model_fn([x])     # model takes a list of images
        return outs[0]                # return first output


def make_inner_model(w_oihw, bias):
    # OIHW -> (C_OUT, K*K*C_IN) with column order (dy, dx, ci), matching the
    # kernel's tap-row ordering, then zero-pad the contraction dim to KKC_PAD.
    # Done once at model-build time.
    w36 = jnp.transpose(w_oihw, (0, 2, 3, 1)).reshape(C_OUT, KKC)
    w_mat = jnp.pad(w36, ((0, 0), (0, KKC_PAD - KKC))).astype(jnp.float32)
    b_mat = bias.reshape(C_OUT, 1).astype(jnp.float32)

    def model_fn(image_list):
        return [conv3x3_relu_pallas(img, w_mat, b_mat) for img in image_list]

    return model_fn


# ----------------------------- reference (pure JAX) ---------------------------
def _reference_conv(x_nchw, weight, bias):
    out = jax.lax.conv_general_dilated(
        x_nchw.astype(jnp.float32),
        weight.astype(jnp.float32),          # [C_OUT, C_IN, K, K]
        window_strides=(1, 1),
        padding="SAME",
        dimension_numbers=("NCHW", "OIHW", "NCHW"),
    )
    out = out + bias.reshape(1, C_OUT, 1, 1)
    return jnp.maximum(out, 0.0)


if __name__ == "__main__":
    key = jax.random.PRNGKey(0)
    k_x, k_w, k_b = jax.random.split(key, 3)

    x = jax.random.normal(k_x, (N, C_IN, H, W), dtype=jnp.float32)
    # weight stored OIHW (PyTorch conv convention)
    w_oihw = jax.random.normal(k_w, (C_OUT, C_IN, K, K), dtype=jnp.float32) * 0.1
    bias = jax.random.normal(k_b, (C_OUT,), dtype=jnp.float32) * 0.1

    model = WrappedModelJAX(make_inner_model(w_oihw, bias))

    out = model(x)
    out = jax.block_until_ready(out)

    ref = jax.block_until_ready(_reference_conv(x, w_oihw, bias))
    assert out.shape == (N, C_OUT, H, W), out.shape
    assert jnp.allclose(out, ref, atol=1e-3, rtol=1e-3), float(
        jnp.max(jnp.abs(out - ref)))

    print("KERNEL_OK")
</pallas_src>

<mosaic_0001>
module attributes {stable_mosaic.version = 11 : i64} {
  func.func @_conv3x3_relu_kernel(%arg0: i32, %arg1: memref<2x4x256xf32, #tpu.memory_space<vmem>>, %arg2: memref<8x40xf32, #tpu.memory_space<vmem>>, %arg3: memref<8x1xf32, #tpu.memory_space<vmem>>, %arg4: memref<2x8x256xf32, #tpu.memory_space<vmem>>, %arg5: memref<2x4x512xf32, #tpu.memory_space<vmem>>, %arg6: memref<40x512xf32, #tpu.memory_space<vmem>>) attributes {dimension_semantics = [#tpu.dimension_semantics<arbitrary>], iteration_bounds = array<i64: 1>, scalar_prefetch = 0 : i64, scratch_operands = 2 : i64, tpu.core_type = #tpu.core_type<tc>, window_params = [{pipeline_mode = #tpu.pipeline_mode<synchronous>, transform_indices = @transform_0, window_bounds = array<i64: 2, 4, 256>}, {pipeline_mode = #tpu.pipeline_mode<synchronous>, transform_indices = @transform_1, window_bounds = array<i64: 8, 40>}, {pipeline_mode = #tpu.pipeline_mode<synchronous>, transform_indices = @transform_2, window_bounds = array<i64: 8, 1>}, {pipeline_mode = #tpu.pipeline_mode<synchronous>, transform_indices = @transform_3, window_bounds = array<i64: 2, 8, 256>}]} {
    %cst = arith.constant 0.000000e+00 : f32
    %0 = vector.broadcast %cst : f32 to vector<2x4x512xf32>
    %c0 = arith.constant 0 : index
    %c0_0 = arith.constant 0 : index
    %c0_1 = arith.constant 0 : index
    %1 = vector.load %arg5[%c0, %c0_0, %c0_1] : memref<2x4x512xf32, #tpu.memory_space<vmem>>, vector<2x4x512xf32>
    tpu.vector_store %arg5[%c0, %c0_0, %c0_1], %0 {strides = array<i32>} : memref<2x4x512xf32, #tpu.memory_space<vmem>>, vector<2x4x512xf32>,
    %c0_2 = arith.constant 0 : index
    %c0_3 = arith.constant 0 : index
    %c0_4 = arith.constant 0 : index
    %2 = vector.load %arg1[%c0_2, %c0_3, %c0_4] : memref<2x4x256xf32, #tpu.memory_space<vmem>>, vector<1x4x256xf32>
    %3 = vector.shape_cast %2 : vector<1x4x256xf32> to vector<4x256xf32>
    %c0_5 = arith.constant 0 : index
    %c0_6 = arith.constant 0 : index
    %c128 = arith.constant 128 : index
    %4 = vector.load %arg5[%c0_5, %c0_6, %c128] : memref<2x4x512xf32, #tpu.memory_space<vmem>>, vector<1x4x256xf32>
    %5 = vector.shape_cast %4 : vector<1x4x256xf32> to vector<4x256xf32>
    %6 = vector.shape_cast %3 : vector<4x256xf32> to vector<1x4x256xf32>
    tpu.vector_store %arg5[%c0_5, %c0_6, %c128], %6 {strides = array<i32>} : memref<2x4x512xf32, #tpu.memory_space<vmem>>, vector<1x4x256xf32>,
    %c1 = arith.constant 1 : index
    %c0_7 = arith.constant 0 : index
    %c0_8 = arith.constant 0 : index
    %7 = vector.load %arg1[%c1, %c0_7, %c0_8] : memref<2x4x256xf32, #tpu.memory_space<vmem>>, vector<1x4x256xf32>
    %8 = vector.shape_cast %7 : vector<1x4x256xf32> to vector<4x256xf32>
    %c1_9 = arith.constant 1 : index
    %c0_10 = arith.constant 0 : index
    %c128_11 = arith.constant 128 : index
    %9 = vector.load %arg5[%c1_9, %c0_10, %c128_11] : memref<2x4x512xf32, #tpu.memory_space<vmem>>, vector<1x4x256xf32>
    %10 = vector.shape_cast %9 : vector<1x4x256xf32> to vector<4x256xf32>
    %11 = vector.shape_cast %8 : vector<4x256xf32> to vector<1x4x256xf32>
    tpu.vector_store %arg5[%c1_9, %c0_10, %c128_11], %11 {strides = array<i32>} : memref<2x4x512xf32, #tpu.memory_space<vmem>>, vector<1x4x256xf32>,
    %12 = tpu.iota {dimensions = array<i32: 1>} : vector<4x256xi32>
    %c16_i32 = arith.constant 16 : i32
    %c0_i32 = arith.constant 0 : i32
    %13 = arith.cmpi eq, %c16_i32, %c0_i32 : i32
    %c1_i32 = arith.constant 1 : i32
    %14 = arith.select %13, %c1_i32, %c16_i32 : i32
    %15 = vector.broadcast %14 : i32 to vector<4x256xi32>
    %16 = arith.remsi %12, %15 : vector<4x256xi32>
    %c0_i32_12 = arith.constant 0 : i32
    %17 = vector.broadcast %c0_i32_12 : i32 to vector<4x256xi32>
    %18 = arith.cmpi ne, %16, %17 : vector<4x256xi32>
    %c0_i32_13 = arith.constant 0 : i32
    %19 = vector.broadcast %c0_i32_13 : i32 to vector<4x256xi32>
    %20 = arith.cmpi slt, %16, %19 : vector<4x256xi32>
    %c0_i32_14 = arith.constant 0 : i32
    %21 = arith.cmpi slt, %14, %c0_i32_14 : i32
    %22 = vector.broadcast %21 : i1 to vector<4x256xi1>
    %23 = vector.broadcast %22 : vector<4x256xi1> to vector<4x256xi1>
    %24 = arith.xori %20, %23 : vector<4x256xi1>
    %25 = arith.andi %24, %18 : vector<4x256xi1>
    %26 = vector.broadcast %14 : i32 to vector<4x256xi32>
    %27 = arith.addi %16, %26 : vector<4x256xi32>
    %28 = arith.select %25, %27, %16 : vector<4x256xi1>, vector<4x256xi32>
    %c0_i32_15 = arith.constant 0 : i32
    %29 = vector.broadcast %c0_i32_15 : i32 to vector<4x256xi32>
    %30 = arith.cmpi eq, %28, %29 : vector<4x256xi32>
    %c15_i32 = arith.constant 15 : i32
    %31 = vector.broadcast %c15_i32 : i32 to vector<4x256xi32>
    %32 = arith.cmpi eq, %28, %31 : vector<4x256xi32>
    %cst_16 = arith.constant 0.000000e+00 : f32
    %33 = vector.broadcast %cst_16 : f32 to vector<4x512xf32>
    %c36 = arith.constant 36 : index
    %c0_17 = arith.constant 0 : index
    %34 = vector.load %arg6[%c36, %c0_17] : memref<40x512xf32, #tpu.memory_space<vmem>>, vector<4x512xf32>
    tpu.vector_store %arg6[%c36, %c0_17], %33 {strides = array<i32>} : memref<40x512xf32, #tpu.memory_space<vmem>>, vector<4x512xf32>,
    %c0_18 = arith.constant 0 : index
    %c0_19 = arith.constant 0 : index
    %c111 = arith.constant 111 : index
    %35 = vector.load %arg5[%c0_18, %c0_19, %c111] : memref<2x4x512xf32, #tpu.memory_space<vmem>>, vector<1x4x256xf32>
    %36 = vector.shape_cast %35 : vector<1x4x256xf32> to vector<4x256xf32>
    %cst_20 = arith.constant 0.000000e+00 : f32
    %37 = vector.broadcast %cst_20 : f32 to vector<4x256xf32>
    %38 = arith.select %30, %37, %36 : vector<4x256xi1>, vector<4x256xf32>
    %c0_21 = arith.constant 0 : index
    %c0_22 = arith.constant 0 : index
    %39 = vector.load %arg6[%c0_21, %c0_22] : memref<40x512xf32, #tpu.memory_space<vmem>>, vector<4x256xf32>
    tpu.vector_store %arg6[%c0_21, %c0_22], %38 {strides = array<i32>} : memref<40x512xf32, #tpu.memory_space<vmem>>, vector<4x256xf32>,
    %c1_23 = arith.constant 1 : index
    %c0_24 = arith.constant 0 : index
    %c111_25 = arith.constant 111 : index
    %40 = vector.load %arg5[%c1_23, %c0_24, %c111_25] : memref<2x4x512xf32, #tpu.memory_space<vmem>>, vector<1x4x256xf32>
    %41 = vector.shape_cast %40 : vector<1x4x256xf32> to vector<4x256xf32>
    %cst_26 = arith.constant 0.000000e+00 : f32
    %42 = vector.broadcast %cst_26 : f32 to vector<4x256xf32>
    %43 = arith.select %30, %42, %41 : vector<4x256xi1>, vector<4x256xf32>
    %c0_27 = arith.constant 0 : index
    %c256 = arith.constant 256 : index
    %44 = vector.load %arg6[%c0_27, %c256] : memref<40x512xf32, #tpu.memory_space<vmem>>, vector<4x256xf32>
    tpu.vector_store %arg6[%c0_27, %c256], %43 {strides = array<i32>} : memref<40x512xf32, #tpu.memory_space<vmem>>, vector<4x256xf32>,
    %c0_28 = arith.constant 0 : index
    %c0_29 = arith.constant 0 : index
    %c112 = arith.constant 112 : index
    %45 = vector.load %arg5[%c0_28, %c0_29, %c112] : memref<2x4x512xf32, #tpu.memory_space<vmem>>, vector<1x4x256xf32>
    %46 = vector.shape_cast %45 : vector<1x4x256xf32> to vector<4x256xf32>
    %c4 = arith.constant 4 : index
    %c0_30 = arith.constant 0 : index
    %47 = vector.load %arg6[%c4, %c0_30] : memref<40x512xf32, #tpu.memory_space<vmem>>, vector<4x256xf32>
    tpu.vector_store %arg6[%c4, %c0_30], %46 {strides = array<i32>} : memref<40x512xf32, #tpu.memory_space<vmem>>, vector<4x256xf32>,
    %c1_31 = arith.constant 1 : index
    %c0_32 = arith.constant 0 : index
    %c112_33 = arith.constant 112 : index
    %48 = vector.load %arg5[%c1_31, %c0_32, %c112_33] : memref<2x4x512xf32, #tpu.memory_space<vmem>>, vector<1x4x256xf32>
    %49 = vector.shape_cast %48 : vector<1x4x256xf32> to vector<4x256xf32>
    %c4_34 = arith.constant 4 : index
    %c256_35 = arith.constant 256 : index
    %50 = vector.load %arg6[%c4_34, %c256_35] : memref<40x512xf32, #tpu.memory_space<vmem>>, vector<4x256xf32>
    tpu.vector_store %arg6[%c4_34, %c256_35], %49 {strides = array<i32>} : memref<40x512xf32, #tpu.memory_space<vmem>>, vector<4x256xf32>,
    %c0_36 = arith.constant 0 : index
    %c0_37 = arith.constant 0 : index
    %c113 = arith.constant 113 : index
    %51 = vector.load %arg5[%c0_36, %c0_37, %c113] : memref<2x4x512xf32, #tpu.memory_space<vmem>>, vector<1x4x256xf32>
    %52 = vector.shape_cast %51 : vector<1x4x256xf32> to vector<4x256xf32>
    %cst_38 = arith.constant 0.000000e+00 : f32
    %53 = vector.broadcast %cst_38 : f32 to vector<4x256xf32>
    %54 = arith.select %32, %53, %52 : vector<4x256xi1>, vector<4x256xf32>
    %c8 = arith.constant 8 : index
    %c0_39 = arith.constant 0 : index
    %55 = vector.load %arg6[%c8, %c0_39] : memref<40x512xf32, #tpu.memory_space<vmem>>, vector<4x256xf32>
    tpu.vector_store %arg6[%c8, %c0_39], %54 {strides = array<i32>} : memref<40x512xf32, #tpu.memory_space<vmem>>, vector<4x256xf32>,
    %c1_40 = arith.constant 1 : index
    %c0_41 = arith.constant 0 : index
    %c113_42 = arith.constant 113 : index
    %56 = vector.load %arg5[%c1_40, %c0_41, %c113_42] : memref<2x4x512xf32, #tpu.memory_space<vmem>>, vector<1x4x256xf32>
    %57 = vector.shape_cast %56 : vector<1x4x256xf32> to vector<4x256xf32>
    %cst_43 = arith.constant 0.000000e+00 : f32
    %58 = vector.broadcast %cst_43 : f32 to vector<4x256xf32>
    %59 = arith.select %32, %58, %57 : vector<4x256xi1>, vector<4x256xf32>
    %c8_44 = arith.constant 8 : index
    %c256_45 = arith.constant 256 : index
    %60 = vector.load %arg6[%c8_44, %c256_45] : memref<40x512xf32, #tpu.memory_space<vmem>>, vector<4x256xf32>
    tpu.vector_store %arg6[%c8_44, %c256_45], %59 {strides = array<i32>} : memref<40x512xf32, #tpu.memory_space<vmem>>, vector<4x256xf32>,
    %c0_46 = arith.constant 0 : index
    %c0_47 = arith.constant 0 : index
    %c127 = arith.constant 127 : index
    %61 = vector.load %arg5[%c0_46, %c0_47, %c127] : memref<2x4x512xf32, #tpu.memory_space<vmem>>, vector<1x4x256xf32>
    %62 = vector.shape_cast %61 : vector<1x4x256xf32> to vector<4x256xf32>
    %cst_48 = arith.constant 0.000000e+00 : f32
    %63 = vector.broadcast %cst_48 : f32 to vector<4x256xf32>
    %64 = arith.select %30, %63, %62 : vector<4x256xi1>, vector<4x256xf32>
    %c12 = arith.constant 12 : index
    %c0_49 = arith.constant 0 : index
    %65 = vector.load %arg6[%c12, %c0_49] : memref<40x512xf32, #tpu.memory_space<vmem>>, vector<4x256xf32>
    tpu.vector_store %arg6[%c12, %c0_49], %64 {strides = array<i32>} : memref<40x512xf32, #tpu.memory_space<vmem>>, vector<4x256xf32>,
    %c1_50 = arith.constant 1 : index
    %c0_51 = arith.constant 0 : index
    %c127_52 = arith.constant 127 : index
    %66 = vector.load %arg5[%c1_50, %c0_51, %c127_52] : memref<2x4x512xf32, #tpu.memory_space<vmem>>, vector<1x4x256xf32>
    %67 = vector.shape_cast %66 : vector<1x4x256xf32> to vector<4x256xf32>
    %cst_53 = arith.constant 0.000000e+00 : f32
    %68 = vector.broadcast %cst_53 : f32 to vector<4x256xf32>
    %69 = arith.select %30, %68, %67 : vector<4x256xi1>, vector<4x256xf32>
    %c12_54 = arith.constant 12 : index
    %c256_55 = arith.constant 256 : index
    %70 = vector.load %arg6[%c12_54, %c256_55] : memref<40x512xf32, #tpu.memory_space<vmem>>, vector<4x256xf32>
    tpu.vector_store %arg6[%c12_54, %c256_55], %69 {strides = array<i32>} : memref<40x512xf32, #tpu.memory_space<vmem>>, vector<4x256xf32>,
    %c0_56 = arith.constant 0 : index
    %c0_57 = arith.constant 0 : index
    %c128_58 = arith.constant 128 : index
    %71 = vector.load %arg5[%c0_56, %c0_57, %c128_58] : memref<2x4x512xf32, #tpu.memory_space<vmem>>, vector<1x4x256xf32>
    %72 = vector.shape_cast %71 : vector<1x4x256xf32> to vector<4x256xf32>
    %c16 = arith.constant 16 : index
    %c0_59 = arith.constant 0 : index
    %73 = vector.load %arg6[%c16, %c0_59] : memref<40x512xf32, #tpu.memory_space<vmem>>, vector<4x256xf32>
    tpu.vector_store %arg6[%c16, %c0_59], %72 {strides = array<i32>} : memref<40x512xf32, #tpu.memory_space<vmem>>, vector<4x256xf32>,
    %c1_60 = arith.constant 1 : index
    %c0_61 = arith.constant 0 : index
    %c128_62 = arith.constant 128 : index
    %74 = vector.load %arg5[%c1_60, %c0_61, %c128_62] : memref<2x4x512xf32, #tpu.memory_space<vmem>>, vector<1x4x256xf32>
    %75 = vector.shape_cast %74 : vector<1x4x256xf32> to vector<4x256xf32>
    %c16_63 = arith.constant 16 : index
    %c256_64 = arith.constant 256 : index
    %76 = vector.load %arg6[%c16_63, %c256_64] : memref<40x512xf32, #tpu.memory_space<vmem>>, vector<4x256xf32>
    tpu.vector_store %arg6[%c16_63, %c256_64], %75 {strides = array<i32>} : memref<40x512xf32, #tpu.memory_space<vmem>>, vector<4x256xf32>,
    %c0_65 = arith.constant 0 : index
    %c0_66 = arith.constant 0 : index
    %c129 = arith.constant 129 : index
    %77 = vector.load %arg5[%c0_65, %c0_66, %c129] : memref<2x4x512xf32, #tpu.memory_space<vmem>>, vector<1x4x256xf32>
    %78 = vector.shape_cast %77 : vector<1x4x256xf32> to vector<4x256xf32>
    %cst_67 = arith.constant 0.000000e+00 : f32
    %79 = vector.broadcast %cst_67 : f32 to vector<4x256xf32>
    %80 = arith.select %32, %79, %78 : vector<4x256xi1>, vector<4x256xf32>
    %c20 = arith.constant 20 : index
    %c0_68 = arith.constant 0 : index
    %81 = vector.load %arg6[%c20, %c0_68] : memref<40x512xf32, #tpu.memory_space<vmem>>, vector<4x256xf32>
    tpu.vector_store %arg6[%c20, %c0_68], %80 {strides = array<i32>} : memref<40x512xf32, #tpu.memory_space<vmem>>, vector<4x256xf32>,
    %c1_69 = arith.constant 1 : index
    %c0_70 = arith.constant 0 : index
    %c129_71 = arith.constant 129 : index
    %82 = vector.load %arg5[%c1_69, %c0_70, %c129_71] : memref<2x4x512xf32, #tpu.memory_space<vmem>>, vector<1x4x256xf32>
    %83 = vector.shape_cast %82 : vector<1x4x256xf32> to vector<4x256xf32>
    %cst_72 = arith.constant 0.000000e+00 : f32
    %84 = vector.broadcast %cst_72 : f32 to vector<4x256xf32>
    %85 = arith.select %32, %84, %83 : vector<4x256xi1>, vector<4x256xf32>
    %c20_73 = arith.constant 20 : index
    %c256_74 = arith.constant 256 : index
    %86 = vector.load %arg6[%c20_73, %c256_74] : memref<40x512xf32, #tpu.memory_space<vmem>>, vector<4x256xf32>
    tpu.vector_store %arg6[%c20_73, %c256_74], %85 {strides = array<i32>} : memref<40x512xf32, #tpu.memory_space<vmem>>, vector<4x256xf32>,
    %c0_75 = arith.constant 0 : index
    %c0_76 = arith.constant 0 : index
    %c143 = arith.constant 143 : index
    %87 = vector.load %arg5[%c0_75, %c0_76, %c143] : memref<2x4x512xf32, #tpu.memory_space<vmem>>, vector<1x4x256xf32>
    %88 = vector.shape_cast %87 : vector<1x4x256xf32> to vector<4x256xf32>
    %cst_77 = arith.constant 0.000000e+00 : f32
    %89 = vector.broadcast %cst_77 : f32 to vector<4x256xf32>
    %90 = arith.select %30, %89, %88 : vector<4x256xi1>, vector<4x256xf32>
    %c24 = arith.constant 24 : index
    %c0_78 = arith.constant 0 : index
    %91 = vector.load %arg6[%c24, %c0_78] : memref<40x512xf32, #tpu.memory_space<vmem>>, vector<4x256xf32>
    tpu.vector_store %arg6[%c24, %c0_78], %90 {strides = array<i32>} : memref<40x512xf32, #tpu.memory_space<vmem>>, vector<4x256xf32>,
    %c1_79 = arith.constant 1 : index
    %c0_80 = arith.constant 0 : index
    %c143_81 = arith.constant 143 : index
    %92 = vector.load %arg5[%c1_79, %c0_80, %c143_81] : memref<2x4x512xf32, #tpu.memory_space<vmem>>, vector<1x4x256xf32>
    %93 = vector.shape_cast %92 : vector<1x4x256xf32> to vector<4x256xf32>
    %cst_82 = arith.constant 0.000000e+00 : f32
    %94 = vector.broadcast %cst_82 : f32 to vector<4x256xf32>
    %95 = arith.select %30, %94, %93 : vector<4x256xi1>, vector<4x256xf32>
    %c24_83 = arith.constant 24 : index
    %c256_84 = arith.constant 256 : index
    %96 = vector.load %arg6[%c24_83, %c256_84] : memref<40x512xf32, #tpu.memory_space<vmem>>, vector<4x256xf32>
    tpu.vector_store %arg6[%c24_83, %c256_84], %95 {strides = array<i32>} : memref<40x512xf32, #tpu.memory_space<vmem>>, vector<4x256xf32>,
    %c0_85 = arith.constant 0 : index
    %c0_86 = arith.constant 0 : index
    %c144 = arith.constant 144 : index
    %97 = vector.load %arg5[%c0_85, %c0_86, %c144] : memref<2x4x512xf32, #tpu.memory_space<vmem>>, vector<1x4x256xf32>
    %98 = vector.shape_cast %97 : vector<1x4x256xf32> to vector<4x256xf32>
    %c28 = arith.constant 28 : index
    %c0_87 = arith.constant 0 : index
    %99 = vector.load %arg6[%c28, %c0_87] : memref<40x512xf32, #tpu.memory_space<vmem>>, vector<4x256xf32>
    tpu.vector_store %arg6[%c28, %c0_87], %98 {strides = array<i32>} : memref<40x512xf32, #tpu.memory_space<vmem>>, vector<4x256xf32>,
    %c1_88 = arith.constant 1 : index
    %c0_89 = arith.constant 0 : index
    %c144_90 = arith.constant 144 : index
    %100 = vector.load %arg5[%c1_88, %c0_89, %c144_90] : memref<2x4x512xf32, #tpu.memory_space<vmem>>, vector<1x4x256xf32>
    %101 = vector.shape_cast %100 : vector<1x4x256xf32> to vector<4x256xf32>
    %c28_91 = arith.constant 28 : index
    %c256_92 = arith.constant 256 : index
    %102 = vector.load %arg6[%c28_91, %c256_92] : memref<40x512xf32, #tpu.memory_space<vmem>>, vector<4x256xf32>
    tpu.vector_store %arg6[%c28_91, %c256_92], %101 {strides = array<i32>} : memref<40x512xf32, #tpu.memory_space<vmem>>, vector<4x256xf32>,
    %c0_93 = arith.constant 0 : index
    %c0_94 = arith.constant 0 : index
    %c145 = arith.constant 145 : index
    %103 = vector.load %arg5[%c0_93, %c0_94, %c145] : memref<2x4x512xf32, #tpu.memory_space<vmem>>, vector<1x4x256xf32>
    %104 = vector.shape_cast %103 : vector<1x4x256xf32> to vector<4x256xf32>
    %cst_95 = arith.constant 0.000000e+00 : f32
    %105 = vector.broadcast %cst_95 : f32 to vector<4x256xf32>
    %106 = arith.select %32, %105, %104 : vector<4x256xi1>, vector<4x256xf32>
    %c32 = arith.constant 32 : index
    %c0_96 = arith.constant 0 : index
    %107 = vector.load %arg6[%c32, %c0_96] : memref<40x512xf32, #tpu.memory_space<vmem>>, vector<4x256xf32>
    tpu.vector_store %arg6[%c32, %c0_96], %106 {strides = array<i32>} : memref<40x512xf32, #tpu.memory_space<vmem>>, vector<4x256xf32>,
    %c1_97 = arith.constant 1 : index
    %c0_98 = arith.constant 0 : index
    %c145_99 = arith.constant 145 : index
    %108 = vector.load %arg5[%c1_97, %c0_98, %c145_99] : memref<2x4x512xf32, #tpu.memory_space<vmem>>, vector<1x4x256xf32>
    %109 = vector.shape_cast %108 : vector<1x4x256xf32> to vector<4x256xf32>
    %cst_100 = arith.constant 0.000000e+00 : f32
    %110 = vector.broadcast %cst_100 : f32 to vector<4x256xf32>
    %111 = arith.select %32, %110, %109 : vector<4x256xi1>, vector<4x256xf32>
    %c32_101 = arith.constant 32 : index
    %c256_102 = arith.constant 256 : index
    %112 = vector.load %arg6[%c32_101, %c256_102] : memref<40x512xf32, #tpu.memory_space<vmem>>, vector<4x256xf32>
    tpu.vector_store %arg6[%c32_101, %c256_102], %111 {strides = array<i32>} : memref<40x512xf32, #tpu.memory_space<vmem>>, vector<4x256xf32>,
    %c0_103 = arith.constant 0 : index
    %c0_104 = arith.constant 0 : index
    %113 = vector.load %arg2[%c0_103, %c0_104] : memref<8x40xf32, #tpu.memory_space<vmem>>, vector<8x40xf32>
    %c0_105 = arith.constant 0 : index
    %c0_106 = arith.constant 0 : index
    %114 = vector.load %arg6[%c0_105, %c0_106] : memref<40x512xf32, #tpu.memory_space<vmem>>, vector<40x512xf32>
    %cst_107 = arith.constant dense<0.000000e+00> : vector<8x512xf32>
    %115 = tpu.matmul %113, %114, %cst_107 {dimension_numbers = #tpu.dot_dimension_numbers<[1], [0], [0], [1], [0, 0, 1, 1], [], []>} : vector<8x40xf32>, vector<40x512xf32>, vector<8x512xf32> -> vector<8x512xf32>
    %c0_108 = arith.constant 0 : index
    %c0_109 = arith.constant 0 : index
    %116 = vector.load %arg3[%c0_108, %c0_109] : memref<8x1xf32, #tpu.memory_space<vmem>>, vector<8x1xf32>
    %117 = vector.broadcast %116 : vector<8x1xf32> to vector<8x512xf32>
    %118 = arith.addf %115, %117 : vector<8x512xf32>
    %cst_110 = arith.constant 0.000000e+00 : f32
    %119 = vector.broadcast %cst_110 : f32 to vector<8x512xf32>
    %120 = arith.maximumf %118, %119 : vector<8x512xf32>
    %121 = vector.extract_strided_slice %120 {offsets = [0, 0], sizes = [8, 256], strides = [1, 1]} : vector<8x512xf32> to vector<8x256xf32>
    %c0_111 = arith.constant 0 : index
    %c0_112 = arith.constant 0 : index
    %c0_113 = arith.constant 0 : index
    %122 = vector.load %arg4[%c0_111, %c0_112, %c0_113] : memref<2x8x256xf32, #tpu.memory_space<vmem>>, vector<1x8x256xf32>
    %123 = vector.shape_cast %122 : vector<1x8x256xf32> to vector<8x256xf32>
    %124 = vector.shape_cast %121 : vector<8x256xf32> to vector<1x8x256xf32>
    tpu.vector_store %arg4[%c0_111, %c0_112, %c0_113], %124 {strides = array<i32>} : memref<2x8x256xf32, #tpu.memory_space<vmem>>, vector<1x8x256xf32>,
    %125 = vector.extract_strided_slice %120 {offsets = [0, 256], sizes = [8, 256], strides = [1, 1]} : vector<8x512xf32> to vector<8x256xf32>
    %c1_114 = arith.constant 1 : index
    %c0_115 = arith.constant 0 : index
    %c0_116 = arith.constant 0 : index
    %126 = vector.load %arg4[%c1_114, %c0_115, %c0_116] : memref<2x8x256xf32, #tpu.memory_space<vmem>>, vector<1x8x256xf32>
    %127 = vector.shape_cast %126 : vector<1x8x256xf32> to vector<8x256xf32>
    %128 = vector.shape_cast %125 : vector<8x256xf32> to vector<1x8x256xf32>
    tpu.vector_store %arg4[%c1_114, %c0_115, %c0_116], %128 {strides = array<i32>} : memref<2x8x256xf32, #tpu.memory_space<vmem>>, vector<1x8x256xf32>,
    return
  }
  func.func @transform_0(%arg0: i32) -> (i32, i32, i32) {
    %c0_i32 = arith.constant 0 : i32
    %c0_i32_0 = arith.constant 0 : i32
    %c0_i32_1 = arith.constant 0 : i32
    %c0_i32_2 = arith.constant 0 : i32
    return %c0_i32, %c0_i32_0, %c0_i32_1 : i32, i32, i32
  }
  func.func @transform_1(%arg0: i32) -> (i32, i32) {
    %c0_i32 = arith.constant 0 : i32
    %c0_i32_0 = arith.constant 0 : i32
    %c0_i32_1 = arith.constant 0 : i32
    return %c0_i32, %c0_i32_0 : i32, i32
  }
  func.func @transform_2(%arg0: i32) -> (i32, i32) {
    %c0_i32 = arith.constant 0 : i32
    %c0_i32_0 = arith.constant 0 : i32
    %c0_i32_1 = arith.constant 0 : i32
    return %c0_i32, %c0_i32_0 : i32, i32
  }
  func.func @transform_3(%arg0: i32) -> (i32, i32, i32) {
    %c0_i32 = arith.constant 0 : i32
    %c0_i32_0 = arith.constant 0 : i32
    %c0_i32_1 = arith.constant 0 : i32
    %c0_i32_2 = arith.constant 0 : i32
    return %c0_i32, %c0_i32_0, %c0_i32_1 : i32, i32, i32
  }
}

</mosaic_0001>

<bundles_post_ra>
// kernel: tpu_custom_call.1
= control target key start
LH: loop header
LB: loop body
LE: loop exit
PB: predicated region body
PF: predicated region fallthrough
CT: control target
= control target key end

     0   :  { %8 = vsyncpa [#allocation5], 0  ;;  %s919_s0 = inlined_call_operand.hbm [shape: f32[2,4,256], index: 0, kind: input, shape index: {}]   ;;  %s920_s1 = inlined_call_operand.vmem [shape: f32[8,40], index: 1, kind: input, shape index: {}]   ;;  %s921_s2 = inlined_call_operand.vmem [shape: f32[8,1], index: 2, kind: input, shape index: {}]   ;;  %s922_s3 = inlined_call_operand.hbm [shape: f32[2,8,256], index: 3, kind: output, shape index: {}]  }
   0x1   :  { %9 = vsyncpa [#allocation6], 0  ;;  %s711_s12 = smov [#allocation4]   ;;  %s663_s16 = scalar_lea.hbm %s919_s0, 256 }
   0x2   :  { %s15_s13 = sshll.u32 %s711_s12, 4  ;;  %p664_p0 = scmp.ne.s32.totalorder %s919_s0, %s663_s16  ;;  %s16_s13 = int_to_ptr.vmem [resolvable:$true] %s15_s13 }
   0x3   :  { %p667_p1 = scmp.lt.u32.totalorder %s663_s16, %s919_s0 }
   0x5   :  { %p669_p2 = pnand %p667_p1, %p664_p0 }
   0x7   :  { %672 = shalt.err (!%p669_p2)
}
   0x8   :  { %s673_s21 = scalar_lea.vmem %s16_s13, 256  ;;  %p678_p4 = scmp.lt.s32.totalorder %s16_s13, %s16_s13 }
   0x9   :  { %p674_p3 = scmp.ne.s32.totalorder %s16_s13, %s673_s21  ;;  %p679_p5 = scmp.lt.s32.totalorder %s673_s21, %s673_s21 }
   0xb   :  { %p680_p6 = por %p679_p5, %p678_p4 }
   0xd   :  { %p681_p7 = pnand %p680_p6, %p674_p3 }
   0xf   :  { %684 = shalt.err (!%p681_p7)
}
  0x10   :  { %s712_s22 = smov 128   ;;  %s713_s23 = smov 8  }
  0x11   :  { %21 = dma.hbm_to_vmem [thread:$0]  %s919_s0, 256, %s16_s13, [#allocation5], %s712_s22, %s712_s22, %s713_s23  }
  0x12   :  { %707 = dma.done.wait [#allocation5], 256  }
  0x13   :  { %708 = vsyncadd [#allocation5], 4294967040  ;;  %v714_v0 = vmov 0.0   ;;  %v758_v1 = vld [vmem:[#allocation4 + $0x8] sm:$0xff]  ;;  %v760_v2 = vld [vmem:[#allocation4] sm:$0xff]  ;;  %s715_s0 = smov 1   ;;  %v39_v31 = vlaneseq }
  0x14   :  { %31 = vst [vmem:[#allocation2 + $0x10] sm:$0xff] %v714_v0  ;;  %32 = vst [vmem:[#allocation2 + $0x18] sm:$0xff] %v714_v0  ;;  %513 = vmatprep.mubr.f32.mxu0 %v714_v0  ;;  %584 = vmatprep.mubr.f32.mxu1 %v714_v0  ;;  %v766_v3 = vcombine.high %v760_v2, %v760_v2  ;;  %v770_v4 = vcombine.high %v758_v1, %v758_v1  ;;  %s716_s26 = smov 17   ;;  %s717_s27 = smov 15   ;;  %v723_v29 = vmov 0   ;;  %v439_v30 = vld [vmem:[%s921_s2] sm:$0xff] }
  0x15   :  { %29 = vst [vmem:[#allocation2] sm:$0xff] %v714_v0  ;;  %30 = vst [vmem:[#allocation2 + $0x8] sm:$0xff] %v714_v0  ;;  %s718_s28 = smov 16   ;;  %s719_s29 = smov 127   ;;  %v346_v25 = vcombine.low %v760_v2, %v760_v2  ;;  %v365_v26 = vcombine.low %v758_v1, %v758_v1  ;;  %650 = vset.pattern.permute.xlu0 %v723_v29  ;;  %v803_v32 = vand.u32 127, %v39_v31  ;;  %vm200_vm0 = vcmask 7168  }
  0x16   :  { %70 = vst [vmem:[#allocation3 + $0x80] sm:$0xf0] %v714_v0  ;;  %71 = vst [vmem:[#allocation3 + $0x88] sm:$0xf0] %v714_v0  ;;  %s720_s30 = smov 113   ;;  %s721_s4 = smov 112  }
  0x17   :  { %72 = vst [vmem:[#allocation3 + $0x90] sm:$0xf0] %v714_v0  ;;  %73 = vst [vmem:[#allocation3 + $0x98] sm:$0xf0] %v714_v0  ;;  %s722_s5 = smov 111   ;;  %v41_v33 = vadd.s32 128, %v803_v32 }
  0x18   :  { %38 = vst [vmem:[#allocation2 + $0x14] sm:$0xff] %v758_v1  ;;  %34 = vst [vmem:[#allocation2 + $0x4] sm:$0xff] %v760_v2  ;;  %v46_v36 = vand.u32 15, %v803_v32  ;;  %vm85_vm3 = vcmask 138240   ;;  %vm161_vm4 = vcmask 121856   ;;  %vm125_vm6 = vcmask 130048  }
  0x19   :  { %244 = vst [vmem:[#allocation3 + $0x40] sm:$0xf] %v760_v2  ;;  %250 = vst [vmem:[#allocation3 + $0x50] sm:$0xf] %v758_v1  ;;  %v53_v37 = vand.u32 15, %v41_v33  ;;  %vm263_vm8 = vcmask 1039360  }
  0x1a   :  { %245 = vst [vmem:[#allocation3 + $0x48] sm:$0xf] %v766_v3  ;;  %251 = vst [vmem:[#allocation3 + $0x58] sm:$0xf] %v770_v4  ;;  %vm809_vm1 = vcmp.eq.s32.totalorder %v46_v36, 0  ;;  %vm855_vm7 = vcmp.eq.s32.totalorder %v46_v36, 15 }
  0x1b   :  { %v279_v20 = vld [vmem:[#allocation2 + $0x1c] sm:$0xf]  ;;  %vm813_vm2 = vcmp.eq.s32.totalorder %v53_v37, 0  ;;  %vm835_vm5 = vcmp.eq.s32.totalorder %v53_v37, 15  ;;  %vm314_vm9 = vcmask 924672   ;;  %vm354_vm10 = vcmask 916480  }
  0x1c   :  { %v253_v19 = vld [vmem:[#allocation2 + $0xc] sm:$0xf]  ;;  %v324_v22 = vld [vmem:[#allocation2 + $0x1c] sm:$0xf]  ;;  %vm390_vm11 = vcmask 908288   ;;  %vm445_vm12 = vcmask 326656  }
  0x1d   :  { %v304_v21 = vld [vmem:[#allocation2 + $0xc] sm:$0xf]  ;;  %v661_v24 = vld [vmem:[#allocation2 + $0x1c] ss:$0 sps:$4 sm:$0xff]   ;;  %s724_s9 = smov [#allocation7]  }
  0x1e   :  { %v659_v23 = vld [vmem:[#allocation2 + $0xc] ss:$0 sps:$4 sm:$0xff]   ;;  %v400_v28 = vld [vmem:[#allocation2 + $0x1c] sm:$0xf]  ;;  %s605_s10 = sshll.u32 %s724_s9, 4  ;;  %s606_s10 = int_to_ptr.vmem [resolvable:$true] %s605_s10 }
  0x1f   :  { %v216_v5 = vld [vmem:[#allocation2 + $0x18] sm:$0xf]  ;;  %v190_v6 = vld [vmem:[#allocation2 + $0x8] sm:$0xf]  ;;  %v215_v7 = vld [vmem:[#allocation2 + $0x10] sm:$0xff]  ;;  %p690_p9 = scmp.lt.s32.totalorder %s606_s10, %s606_s10 }
  0x20   :  { %224 = vrot.lane.b32.xlu1 %v216_v5, %s715_s0  ;;  %198 = vrot.lane.b32.xlu0 %v190_v6, %s715_s0  ;;  %v189_v8 = vld [vmem:[#allocation2] sm:$0xff]  ;;  %v75_v10 = vld [vmem:[#allocation2 + $0x8] sm:$0xf]  ;;  %v95_v11 = vld [vmem:[#allocation2 + $0x18] sm:$0xf]  ;;  %v219_v12 = vcombine.high %v215_v7, %v215_v7  ;;  %v136_v18 = vcombine.low %v215_v7, %v215_v7 }
  0x21   :  { %v193_v9 = vcombine.high %v189_v8, %v189_v8  ;;  %v151_v13 = vld [vmem:[#allocation2 + $0x8] sm:$0xf]  ;;  %v171_v14 = vld [vmem:[#allocation2 + $0x18] sm:$0xf]  ;;  %v117_v17 = vcombine.low %v189_v8, %v189_v8  ;;  %v380_v27 = vld [vmem:[#allocation2 + $0xc] sm:$0xf] }
  0x22   :  { %v653_v15 = vld [vmem:[#allocation2 + $0x8] ss:$0 sps:$4 sm:$0xff]   ;;  %v655_v16 = vld [vmem:[#allocation2 + $0x18] ss:$0 sps:$4 sm:$0xff]  }
  0x24   :  { %220 = vrot.lane.b32.xlu1 %v215_v7, %s715_s0  ;;  %194 = vrot.lane.b32.xlu0 %v189_v8, %s715_s0 }
  0x28   :  { %196 = vrot.lane.b32.xlu0 %v193_v9, %s715_s0  ;;  %83 = vrot.lane.b32.xlu1 %v75_v10, %s716_s26 }
  0x2c   :  { %103 = vrot.lane.b32.xlu1 %v95_v11, %s716_s26  ;;  %81 = vrot.lane.b32.xlu0 %v193_v9, %s716_s26 }
  0x30   :  { %222 = vrot.lane.b32.xlu1 %v219_v12, %s715_s0  ;;  %101 = vrot.lane.b32.xlu0 %v219_v12, %s716_s26 }
  0x34   :  { %159 = vrot.lane.b32.xlu1 %v151_v13, %s717_s27  ;;  %157 = vrot.lane.b32.xlu0 %v193_v9, %s717_s27 }
  0x38   :  { %179 = vrot.lane.b32.xlu1 %v171_v14, %s717_s27  ;;  %177 = vrot.lane.b32.xlu0 %v219_v12, %s717_s27 }
  0x3c   :  { %99 = vrot.lane.b32.xlu1 %v215_v7, %s716_s26  ;;  %79 = vrot.lane.b32.xlu0 %v189_v8, %s716_s26 }
  0x40   :  { %123 = vrot.lane.b32.xlu1 %v653_v15, %s718_s28  ;;  %121 = vrot.lane.b32.xlu0 %v189_v8, %s718_s28 }
  0x44   :  { %142 = vrot.lane.b32.xlu1 %v655_v16, %s718_s28  ;;  %140 = vrot.lane.b32.xlu0 %v215_v7, %s718_s28 }
  0x48   :  { %175 = vrot.lane.b32.xlu1 %v215_v7, %s717_s27  ;;  %155 = vrot.lane.b32.xlu0 %v189_v8, %s717_s27 }
  0x4c   :  { %138 = vrot.lane.b32.xlu1 %v136_v18, %s718_s28  ;;  %119 = vrot.lane.b32.xlu0 %v117_v17, %s718_s28 }
  0x50   :  { %261 = vrot.lane.b32.xlu1 %v253_v19, %s719_s29  ;;  %259 = vrot.lane.b32.xlu0 %v766_v3, %s719_s29 }
  0x54   :  { %287 = vrot.lane.b32.xlu1 %v279_v20, %s719_s29  ;;  %285 = vrot.lane.b32.xlu0 %v770_v4, %s719_s29 }
  0x58   :  { %283 = vrot.lane.b32.xlu1 %v758_v1, %s719_s29  ;;  %257 = vrot.lane.b32.xlu0 %v760_v2, %s719_s29 }
  0x5c   :  { %312 = vrot.lane.b32.xlu1 %v304_v21, %s720_s30  ;;  %310 = vrot.lane.b32.xlu0 %v766_v3, %s720_s30 }
  0x60   :  { %332 = vrot.lane.b32.xlu1 %v324_v22, %s720_s30  ;;  %330 = vrot.lane.b32.xlu0 %v770_v4, %s720_s30 }
  0x64   :  { %328 = vrot.lane.b32.xlu1 %v758_v1, %s720_s30  ;;  %308 = vrot.lane.b32.xlu0 %v760_v2, %s720_s30 }
  0x68   :  { %352 = vrot.lane.b32.xlu1 %v659_v23, %s721_s4  ;;  %350 = vrot.lane.b32.xlu0 %v760_v2, %s721_s4 }
  0x6c   :  { %371 = vrot.lane.b32.xlu1 %v661_v24, %s721_s4  ;;  %369 = vrot.lane.b32.xlu0 %v758_v1, %s721_s4 }
  0x70   :  { %367 = vrot.lane.b32.xlu1 %v365_v26, %s721_s4  ;;  %348 = vrot.lane.b32.xlu0 %v346_v25, %s721_s4 }
  0x74   :  { %388 = vrot.lane.b32.xlu1 %v380_v27, %s722_s5  ;;  %386 = vrot.lane.b32.xlu0 %v766_v3, %s722_s5 }
  0x78   :  { %408 = vrot.lane.b32.xlu1 %v400_v28, %s722_s5  ;;  %406 = vrot.lane.b32.xlu0 %v770_v4, %s722_s5 }
  0x7c   :  { %404 = vrot.lane.b32.xlu1 %v758_v1, %s722_s5  ;;  %384 = vrot.lane.b32.xlu0 %v760_v2, %s722_s5 }
  0x80   :  { %442 = vperm.xlu0 %650, %v439_v30  }
  0x92   :  { %v225_v34 = vpop.permute.xlu1 %224  ;;  %v199_v35 = vpop.permute.xlu0 %198 }
  0x96   :  { %v221_v38 = vpop.permute.xlu1 %220  ;;  %v195_v39 = vpop.permute.xlu0 %194 }
  0x9a   :  { %v197_v42 = vpop.permute.xlu0 %196  ;;  %v84_v43 = vpop.permute.xlu1 %83 }
  0x9b   :  { %v201_v44 = vsel %vm200_vm0, %v195_v39, %v197_v42  ;;  %v202_v45 = vsel %vm200_vm0, %v197_v42, %v199_v35 }
  0x9c   :  { %v205_v46 = vsel %vm809_vm1, 0.0, %v201_v44  ;;  %v206_v47 = vsel %vm813_vm2, 0.0, %v202_v45 }
  0x9d   :  { %v209_v48 = vrot.slane %v205_v46, 4  ;;  %v210_v49 = vrot.slane %v206_v47, 4 }
  0x9e   :  { %v104_v50 = vpop.permute.xlu1 %103  ;;  %v82_v51 = vpop.permute.xlu0 %81 }
  0x9f   :  { %213 = vst [vmem:[#allocation3 + $0x20] sm:$0xf0] %v209_v48  ;;  %214 = vst [vmem:[#allocation3 + $0x28] sm:$0xf0] %v210_v49  ;;  %v87_v52 = vsel %vm85_vm3, %v82_v51, %v84_v43 }
  0xa0   :  { %v91_v53 = vsel %vm813_vm2, 0.0, %v87_v52 }
  0xa1   :  { %93 = vst [vmem:[#allocation3 + $0x8] sm:$0xf] %v91_v53 }
  0xa2   :  { %v223_v54 = vpop.permute.xlu1 %222  ;;  %v102_v55 = vpop.permute.xlu0 %101 }
  0xa3   :  { %v226_v56 = vsel %vm200_vm0, %v221_v38, %v223_v54  ;;  %v227_v57 = vsel %vm200_vm0, %v223_v54, %v225_v34  ;;  %v106_v58 = vsel %vm85_vm3, %v102_v55, %v104_v50 }
  0xa4   :  { %v230_v59 = vsel %vm809_vm1, 0.0, %v226_v56  ;;  %v231_v60 = vsel %vm813_vm2, 0.0, %v227_v57  ;;  %v110_v61 = vsel %vm813_vm2, 0.0, %v106_v58 }
  0xa5   :  { %v234_v62 = vrot.slane %v230_v59, 4  ;;  %v235_v63 = vrot.slane %v231_v60, 4  ;;  %112 = vst [vmem:[#allocation3 + $0x18] sm:$0xf] %v110_v61 }
  0xa6   :  { %v160_v1 = vpop.permute.xlu1 %159  ;;  %v158_v2 = vpop.permute.xlu0 %157 }
  0xa7   :  { %238 = vst [vmem:[#allocation3 + $0x30] sm:$0xf0] %v234_v62  ;;  %239 = vst [vmem:[#allocation3 + $0x38] sm:$0xf0] %v235_v63  ;;  %v163_v3 = vsel %vm161_vm4, %v158_v2, %v160_v1 }
  0xa8   :  { %v167_v4 = vsel %vm835_vm5, 0.0, %v163_v3 }
  0xa9   :  { %169 = vst [vmem:[#allocation3 + $0x28] sm:$0xf] %v167_v4 }
  0xaa   :  { %v180_v5 = vpop.permute.xlu1 %179  ;;  %v178_v6 = vpop.permute.xlu0 %177 }
  0xab   :  { %v182_v7 = vsel %vm161_vm4, %v178_v6, %v180_v5 }
  0xac   :  { %v186_v8 = vsel %vm835_vm5, 0.0, %v182_v7 }
  0xad   :  { %188 = vst [vmem:[#allocation3 + $0x38] sm:$0xf] %v186_v8 }
  0xae   :  { %v100_v9 = vpop.permute.xlu1 %99  ;;  %v80_v10 = vpop.permute.xlu0 %79 }
  0xaf   :  { %v105_v11 = vsel %vm85_vm3, %v100_v9, %v102_v55  ;;  %v86_v12 = vsel %vm85_vm3, %v80_v10, %v82_v51 }
  0xb0   :  { %v109_v13 = vsel %vm809_vm1, 0.0, %v105_v11  ;;  %v90_v14 = vsel %vm809_vm1, 0.0, %v86_v12  ;;  %v424_v27 = vld [vmem:[#allocation3 + $0x28] sm:$0xff] }
  0xb1   :  { %111 = vst [vmem:[#allocation3 + $0x10] sm:$0xf] %v109_v13  ;;  %92 = vst [vmem:[#allocation3] sm:$0xf] %v90_v14 }
  0xb2   :  { %v124_v15 = vpop.permute.xlu1 %123  ;;  %v122_v16 = vpop.permute.xlu0 %121 }
  0xb3   :  { %v127_v17 = vsel %vm125_vm6, %v122_v16, %v124_v15 }
  0xb4   :  { %131 = vst [vmem:[#allocation3 + $0x8] sm:$0xf0] %v127_v17  ;;  %v426_v36 = vld [vmem:[#allocation3 + $0x38] sm:$0xff] }
  0xb6   :  { %v143_v18 = vpop.permute.xlu1 %142  ;;  %v141_v19 = vpop.permute.xlu0 %140 }
  0xb7   :  { %v145_v20 = vsel %vm125_vm6, %v141_v19, %v143_v18 }
  0xb8   :  { %149 = vst [vmem:[#allocation3 + $0x18] sm:$0xf0] %v145_v20 }
  0xba   :  { %v176_v22 = vpop.permute.xlu1 %175  ;;  %v156_v23 = vpop.permute.xlu0 %155 }
  0xbb   :  { %v181_v24 = vsel %vm161_vm4, %v176_v22, %v178_v6  ;;  %v162_v25 = vsel %vm161_vm4, %v156_v23, %v158_v2  ;;  %v420_v26 = vld [vmem:[#allocation3 + $0x8] sm:$0xff] }
  0xbc   :  { %v185_v28 = vsel %vm855_vm7, 0.0, %v181_v24  ;;  %v166_v29 = vsel %vm855_vm7, 0.0, %v162_v25  ;;  %v619_v30 = vpack.c.bf16 %v424_v27, %v420_v26 }
  0xbd   :  { %187 = vst [vmem:[#allocation3 + $0x30] sm:$0xf] %v185_v28  ;;  %168 = vst [vmem:[#allocation3 + $0x20] sm:$0xf] %v166_v29 }
  0xbe   :  { %v139_v31 = vpop.permute.xlu1 %138  ;;  %620 = vmatprep.subr.bf16.mxu0 %v619_v30  ;;  %v120_v32 = vpop.permute.xlu0 %119 }
  0xbf   :  { %v144_v33 = vsel %vm125_vm6, %v139_v31, %v141_v19  ;;  %v126_v34 = vsel %vm125_vm6, %v120_v32, %v122_v16  ;;  %v422_v35 = vld [vmem:[#allocation3 + $0x18] sm:$0xff] }
  0xc0   :  { %148 = vst [vmem:[#allocation3 + $0x10] sm:$0xf0] %v144_v33  ;;  %130 = vst [vmem:[#allocation3] sm:$0xf0] %v126_v34  ;;  %v627_v37 = vpack.c.bf16 %v426_v36, %v422_v35 }
  0xc2   :  { %v262_v38 = vpop.permute.xlu1 %261  ;;  %628 = vmatprep.subr.bf16.mxu1 %v627_v37  ;;  %v260_v39 = vpop.permute.xlu0 %259 }
  0xc3   :  { %v265_v42 = vsel %vm263_vm8, %v260_v39, %v262_v38 }
  0xc4   :  { %v269_v43 = vsel %vm835_vm5, 0.0, %v265_v42  ;;  %v423_v47 = vld [vmem:[#allocation3 + $0x20] sm:$0xff]  ;;  %v425_v51 = vld [vmem:[#allocation3 + $0x30] sm:$0xff] }
  0xc5   :  { %v273_v44 = vrot.slane %v269_v43, 4 }
  0xc6   :  { %v288_v45 = vpop.permute.xlu1 %287  ;;  %v286_v46 = vpop.permute.xlu0 %285 }
  0xc7   :  { %277 = vst [vmem:[#allocation3 + $0x48] sm:$0xf0] %v273_v44  ;;  %v290_v48 = vsel %vm263_vm8, %v286_v46, %v288_v45  ;;  %v419_v49 = vld [vmem:[#allocation3] sm:$0xff]  ;;  %v421_v50 = vld [vmem:[#allocation3 + $0x10] sm:$0xff] }
  0xc8   :  { %v294_v52 = vsel %vm835_vm5, 0.0, %v290_v48  ;;  %v621_v53 = vpack.c.bf16 %v423_v47, %v419_v49  ;;  %v629_v54 = vpack.c.bf16 %v425_v51, %v421_v50 }
  0xc9   :  { %v298_v55 = vrot.slane %v294_v52, 4 }
  0xca   :  { %v284_v56 = vpop.permute.xlu1 %283  ;;  %622 = vmatpush1.bf16.msra.mxu0 %v621_v53  ;;  %630 = vmatpush1.bf16.msra.mxu1 %v629_v54  ;;  %v258_v57 = vpop.permute.xlu0 %257  ;;  %v418_v53 = vld [vmem:[%s920_s1] sm:$0xff]  ;;  %s685_s1 = scalar_lea.vmem %s606_s10, 512 }
  0xcb   :  { %302 = vst [vmem:[#allocation3 + $0x58] sm:$0xf0] %v298_v55  ;;  %v289_v58 = vsel %vm263_vm8, %v284_v56, %v286_v46  ;;  %v264_v59 = vsel %vm263_vm8, %v258_v57, %v260_v39  ;;  %p686_p8 = scmp.ne.s32.totalorder %s606_s10, %s685_s1  ;;  %p691_p10 = scmp.lt.s32.totalorder %s685_s1, %s685_s1 }
  0xcc   :  { %v293_v60 = vsel %vm855_vm7, 0.0, %v289_v58  ;;  %v268_v61 = vsel %vm855_vm7, 0.0, %v264_v59 }
  0xcd   :  { %v297_v62 = vrot.slane %v293_v60, 4  ;;  %v272_v63 = vrot.slane %v268_v61, 4  ;;  %p692_p11 = por %p691_p10, %p690_p9 }
  0xce   :  { %v313_v1 = vpop.permute.xlu1 %312  ;;  %v311_v2 = vpop.permute.xlu0 %310  ;;  %v428_v25 = vld [vmem:[#allocation3 + $0x48] sm:$0xff] }
  0xcf   :  { %301 = vst [vmem:[#allocation3 + $0x50] sm:$0xf0] %v297_v62  ;;  %276 = vst [vmem:[#allocation3 + $0x40] sm:$0xf0] %v272_v63  ;;  %v316_v3 = vsel %vm314_vm9, %v311_v2, %v313_v1  ;;  %p693_p12 = pnand %p692_p11, %p686_p8 }
  0xd0   :  { %v320_v4 = vsel %vm813_vm2, 0.0, %v316_v3 }
  0xd1   :  { %322 = vst [vmem:[#allocation3 + $0x68] sm:$0xf] %v320_v4 }
  0xd2   :  { %v333_v5 = vpop.permute.xlu1 %332  ;;  %v331_v6 = vpop.permute.xlu0 %330  ;;  %v430_v30 = vld [vmem:[#allocation3 + $0x58] sm:$0xff] }
  0xd3   :  { %v335_v7 = vsel %vm314_vm9, %v331_v6, %v333_v5 }
  0xd4   :  { %v339_v8 = vsel %vm813_vm2, 0.0, %v335_v7 }
  0xd5   :  { %341 = vst [vmem:[#allocation3 + $0x78] sm:$0xf] %v339_v8 }
  0xd6   :  { %v329_v9 = vpop.permute.xlu1 %328  ;;  %v309_v10 = vpop.permute.xlu0 %308  ;;  %v427_v36 = vld [vmem:[#allocation3 + $0x40] sm:$0xff]  ;;  %v429_v39 = vld [vmem:[#allocation3 + $0x50] sm:$0xff] }
  0xd7   :  { %v334_v11 = vsel %vm314_vm9, %v329_v9, %v331_v6  ;;  %v315_v12 = vsel %vm314_vm9, %v309_v10, %v311_v2 }
  0xd8   :  { %v338_v13 = vsel %vm809_vm1, 0.0, %v334_v11  ;;  %v319_v14 = vsel %vm809_vm1, 0.0, %v315_v12 }
  0xd9   :  { %340 = vst [vmem:[#allocation3 + $0x70] sm:$0xf] %v338_v13  ;;  %321 = vst [vmem:[#allocation3 + $0x60] sm:$0xf] %v319_v14 }
  0xda   :  { %v353_v15 = vpop.permute.xlu1 %352  ;;  %v351_v16 = vpop.permute.xlu0 %350 }
  0xdb   :  { %v356_v41 = vsel %vm354_vm10, %v351_v16, %v353_v15 }
  0xdc   :  { %360 = vst [vmem:[#allocation3 + $0x68] sm:$0xf0] %v356_v41 }
  0xde   :  { %v372_v17 = vpop.permute.xlu1 %371  ;;  %v370_v18 = vpop.permute.xlu0 %369 }
  0xdf   :  { %v374_v19 = vsel %vm354_vm10, %v370_v18, %v372_v17 }
  0xe0   :  { %378 = vst [vmem:[#allocation3 + $0x78] sm:$0xf0] %v374_v19 }
  0xe2   :  { %v368_v20 = vpop.permute.xlu1 %367  ;;  %v349_v22 = vpop.permute.xlu0 %348 }
  0xe3   :  { %v373_v23 = vsel %vm354_vm10, %v368_v20, %v370_v18  ;;  %v355_v24 = vsel %vm354_vm10, %v349_v22, %v351_v16  ;;  %v432_v26 = vld [vmem:[#allocation3 + $0x68] sm:$0xff] }
  0xe4   :  { %377 = vst [vmem:[#allocation3 + $0x70] sm:$0xf0] %v373_v23  ;;  %359 = vst [vmem:[#allocation3 + $0x60] sm:$0xf0] %v355_v24  ;;  %v623_v40 = vpack.c.bf16 %v432_v26, %v428_v25 }
  0xe6   :  { %v389_v27 = vpop.permute.xlu1 %388  ;;  %624 = vmatprep.subr.bf16.mxu0 %v623_v40  ;;  %v387_v28 = vpop.permute.xlu0 %386 }
  0xe7   :  { %v392_v29 = vsel %vm390_vm11, %v387_v28, %v389_v27  ;;  %v434_v31 = vld [vmem:[#allocation3 + $0x78] sm:$0xff] }
  0xe8   :  { %v396_v32 = vsel %vm835_vm5, 0.0, %v392_v29  ;;  %v631_v33 = vpack.c.bf16 %v434_v31, %v430_v30 }
  0xe9   :  { %398 = vst [vmem:[#allocation3 + $0x88] sm:$0xf] %v396_v32 }
  0xea   :  { %v409_v34 = vpop.permute.xlu1 %408  ;;  %632 = vmatprep.subr.bf16.mxu1 %v631_v33  ;;  %v407_v35 = vpop.permute.xlu0 %406 }
  0xeb   :  { %v411_v37 = vsel %vm390_vm11, %v407_v35, %v409_v34  ;;  %v431_v38 = vld [vmem:[#allocation3 + $0x60] sm:$0xff]  ;;  %v433_v42 = vld [vmem:[#allocation3 + $0x70] sm:$0xff] }
  0xec   :  { %v415_v43 = vsel %vm835_vm5, 0.0, %v411_v37  ;;  %v625_v44 = vpack.c.bf16 %v431_v38, %v427_v36  ;;  %v633_v45 = vpack.c.bf16 %v433_v42, %v429_v39 }
  0xed   :  { %417 = vst [vmem:[#allocation3 + $0x98] sm:$0xf] %v415_v43 }
  0xee   :  { %v405_v46 = vpop.permute.xlu1 %404  ;;  %626 = vmatpush1.bf16.msra.mxu0 %v625_v44  ;;  %634 = vmatpush1.bf16.msra.mxu1 %v633_v45  ;;  %v385_v47 = vpop.permute.xlu0 %384 }
  0xef   :  { %v410_v48 = vsel %vm390_vm11, %v405_v46, %v407_v35  ;;  %v391_v49 = vsel %vm390_vm11, %v385_v47, %v387_v28 }
  0xf0   :  { %v414_v50 = vsel %vm855_vm7, 0.0, %v410_v48  ;;  %v395_v51 = vsel %vm855_vm7, 0.0, %v391_v49  ;;  %v436_v52 = vld [vmem:[#allocation3 + $0x88] sm:$0xff] }
  0xf1   :  { %416 = vst [vmem:[#allocation3 + $0x90] sm:$0xf] %v414_v50  ;;  %397 = vst [vmem:[#allocation3 + $0x80] sm:$0xf] %v395_v51  ;;  %457 = vmatprep.subr.mxu0 %v436_v52 }
  0xf4   :  { %v438_v0 = vld [vmem:[#allocation3 + $0x98] sm:$0xff] }
  0xf5   :  { %528 = vmatprep.subr.mxu1 %v438_v0 }
  0xf8   :  { %v435_v54 = vld [vmem:[#allocation3 + $0x80] sm:$0xff]  ;;  %v437_v55 = vld [vmem:[#allocation3 + $0x90] sm:$0xff] }
  0xf9   :  { %458 = vmatpush1.msra.mxu0 %v435_v54  ;;  %529 = vmatpush1.msra.mxu1 %v437_v55 }
  0xfa   :  { %617 = vmatmul.mubr.msk.f32.vlgmr.msra.gmra.mrb[0].mxu0 %vm445_vm12, %v418_v53  ;;  %618 = vmatmul.mubr.msk.f32.vlgmr.msra.gmra.mrb[0].mxu1 %vm445_vm12, %v418_v53 }
  0xff   :  { %v443_v56 = vpop.permute.xlu0 %442 }
 0x1cd   :  { %v515_v21 = vpop.f32.mrb[0].mxu0  ;;  %v586_v57 = vpop.f32.mrb[0].mxu1 }
 0x1ce   :  { %v516_v58 = vadd.f32 %v515_v21, %v443_v56  ;;  %v587_v59 = vadd.f32 %v586_v57, %v443_v56  ;;  %v517_v60 = vpop.f32.mrb[1].mxu0  ;;  %v588_v61 = vpop.f32.mrb[1].mxu1 }
 0x1cf   :  { %v518_v62 = vadd.f32 %v517_v60, %v443_v56  ;;  %v589_v63 = vadd.f32 %v588_v61, %v443_v56 }
 0x1d0   :  { %v591_v1 = vmax.f32 %v516_v58, 0.0  ;;  %v593_v2 = vmax.f32 %v587_v59, 0.0 }
 0x1d1   :  { %v592_v3 = vmax.f32 %v518_v62, 0.0  ;;  %v594_v4 = vmax.f32 %v589_v63, 0.0 }
 0x1d2   :  { %595 = vst [vmem:[#allocation7] sm:$0xff] %v591_v1  ;;  %598 = vst [vmem:[#allocation7 + $0x10] sm:$0xff] %v593_v2 }
 0x1d3   :  { %596 = vst [vmem:[#allocation7 + $0x8] sm:$0xff] %v592_v3  ;;  %599 = vst [vmem:[#allocation7 + $0x18] sm:$0xff] %v594_v4 }
 0x1d4   :  { %696 = shalt.err (!%p693_p12)
}
 0x1d5   :  { %s697_s13 = scalar_lea.hbm %s922_s3, 512 }
 0x1d6   :  { %p698_p13 = scmp.ne.s32.totalorder %s922_s3, %s697_s13  ;;  %p701_p0 = scmp.lt.u32.totalorder %s697_s13, %s922_s3 }
 0x1d8   :  { %p703_p1 = pnand %p701_p0, %p698_p13 }
 0x1da   :  { %706 = shalt.err (!%p703_p1)
}
 0x1db   :  { %s725_s18 = smov 256  }
 0x1dc   :  { %611 = dma.vmem_to_hbm [thread:$0]  %s606_s10, 512, %s922_s3, [#allocation6], %s725_s18, %s725_s18, %s718_s28  }
 0x1dd   :  { %709 = dma.done.wait [#allocation6], 512  }
 0x1de   :  { %710 = vsyncadd [#allocation6], 4294966784 }
 0x1df   :  { %615 = vsyncpa [#allocation5], 1 }
 0x1e0   :  { %616 = vsyncpa [#allocation6], 1 }

</bundles_post_ra>
